<compile_context>
chip_gen: v6e
topology: v6e:2x2x1
jax: 0.10.0
libtpu: 0.0.40
codegen_flags: <defaults>
</compile_context>

<pallas_src>
import jax
import jax.numpy as jnp
from jax.experimental import pallas as pl
from jax.experimental.pallas import tpu as pltpu

_LANE = 128        # TPU lane width; layer-2 weights are padded to this at init.
_BATCH_TILE = 256  # batch tile for the gridded large-B path (fills v6e/v7x MXU rows).


def fc_agent_kernel(x_ref, w1_ref, b1_ref, w2_ref, b2_ref, o_ref):
    """relu(x @ w1 + b1) @ w2 + b2; stores only the logical n_actions lanes."""
    # Layer 1: (TB, D_in) @ (D_in, H) + (1, H), ReLU  -- MXU + VPU.
    h = jnp.dot(x_ref[...], w1_ref[...], preferred_element_type=jnp.float32)
    h = jnp.maximum(h + b1_ref[...], 0.0)
    # Layer 2: (TB, H) @ (H, A_pad) + (1, A_pad)  -- lane-dense MXU matmul.
    q = jnp.dot(h, w2_ref[...], preferred_element_type=jnp.float32) + b2_ref[...]
    # Fused "slice": write only the logical action lanes (no padded HBM slab,
    # no wrapper-side slice op).
    n_act = o_ref.shape[-1]  # static Python int at trace time
    o_ref[...] = q[:, :n_act].astype(o_ref.dtype)


def fc_agent_forward(x, w1, b1, w2p, b2p, *, n_actions, batch_tile=_BATCH_TILE):
    """x: (B, D_in); w1: (D_in, H); b1: (1, H); w2p: (H, A_pad); b2p: (1, A_pad).

    Returns Q-values of shape (B, n_actions)."""
    B, d_in = x.shape
    hidden = w1.shape[1]
    a_pad = w2p.shape[1]
    out_shape = jax.ShapeDtypeStruct((B, n_actions), x.dtype)

    if B >= batch_tile and B % batch_tile == 0:
        # Large-batch path: parallel grid over the batch so Mosaic can shard it
        # across TensorCores (v7x has 2 TCs). Weights/biases stay resident: their
        # index_maps pin them to block 0 for every grid step.
        return pl.pallas_call(
            fc_agent_kernel,
            out_shape=out_shape,
            grid=(B // batch_tile,),
            in_specs=[
                pl.BlockSpec((batch_tile, d_in), lambda i: (i, 0)),
                pl.BlockSpec((d_in, hidden), lambda i: (0, 0)),
                pl.BlockSpec((1, hidden), lambda i: (0, 0)),
                pl.BlockSpec((hidden, a_pad), lambda i: (0, 0)),
                pl.BlockSpec((1, a_pad), lambda i: (0, 0)),
            ],
            out_specs=pl.BlockSpec((batch_tile, n_actions), lambda i: (i, 0)),
            compiler_params=pltpu.CompilerParams(
                dimension_semantics=("parallel",)),
        )(x, w1, b1, w2p, b2p)

    # Small-batch path (launch-overhead bound): single invocation, every operand
    # resident in VMEM, no grid / no pipeline double-buffering, and no extra XLA
    # ops (pad/slice) around the custom call.
    # TODO(synk): large B not divisible by batch_tile falls through to this
    # single-shot path; add batch padding or a ragged grid if that case matters.
    return pl.pallas_call(
        fc_agent_kernel,
        out_shape=out_shape,
        in_specs=[pl.BlockSpec(memory_space=pltpu.MemorySpace.VMEM)] * 5,
        out_specs=pl.BlockSpec(memory_space=pltpu.MemorySpace.VMEM),
    )(x, w1, b1, w2p, b2p)


def init_fc_agent_params(key, input_dim, hidden_dim, n_actions):
    """torch.nn.Linear-style init: U(-1/sqrt(fan_in), +1/sqrt(fan_in)).

    Weights are stored kernel-ready: transposed to (in, out), with the layer-2
    output dim pre-padded (zeros) to a 128-lane multiple so no pad ops run per
    forward call. Slice [:, :n_actions] recovers the logical weights."""
    k1, k2, k3, k4 = jax.random.split(key, 4)
    bound1 = 1.0 / jnp.sqrt(jnp.float32(input_dim))
    bound2 = 1.0 / jnp.sqrt(jnp.float32(hidden_dim))
    w1 = jax.random.uniform(k1, (input_dim, hidden_dim), jnp.float32, -bound1, bound1)
    b1 = jax.random.uniform(k2, (1, hidden_dim), jnp.float32, -bound1, bound1)
    w2 = jax.random.uniform(k3, (hidden_dim, n_actions), jnp.float32, -bound2, bound2)
    b2 = jax.random.uniform(k4, (1, n_actions), jnp.float32, -bound2, bound2)
    a_pad = max(_LANE, ((n_actions + _LANE - 1) // _LANE) * _LANE)
    w2p = jnp.pad(w2, ((0, 0), (0, a_pad - n_actions)))
    b2p = jnp.pad(b2, ((0, 0), (0, a_pad - n_actions)))
    return w1, b1, w2p, b2p


if __name__ == "__main__":
    # FcAgent(input_shape=(16,), n_actions=4, hidden_dim=128).
    # TODO(synk): act_strategy (epsilon-greedy) and exp_buffer are not part of the
    # nn forward pass and are left to the caller.
    input_dim, hidden_dim, n_actions = 16, 128, 4

    key = jax.random.PRNGKey(0)
    kx, kb, kp = jax.random.split(key, 3)
    w1, b1, w2p, b2p = init_fc_agent_params(kp, input_dim, hidden_dim, n_actions)
    w2, b2 = w2p[:, :n_actions], b2p[:, :n_actions]  # logical (unpadded) weights for the reference

    fwd = jax.jit(fc_agent_forward, static_argnames=("n_actions", "batch_tile"))

    # 1) Small batch (B=2): no-grid single-shot path; check against pure-JAX math.
    x_small = jax.random.normal(kx, (2, input_dim), jnp.float32)
    out_small = jax.block_until_ready(
        fwd(x_small, w1, b1, w2p, b2p, n_actions=n_actions))
    ref_small = jnp.maximum(x_small @ w1 + b1, 0.0) @ w2 + b2
    assert out_small.shape == (2, n_actions)
    assert jnp.allclose(out_small, ref_small, atol=1e-5, rtol=1e-5)

    # 2) Batched rollout (B=512): parallel batch-grid path with resident weights.
    #    Validate the grid wiring against the (already-verified) single-shot path
    #    of the same kernel, which uses identical in-kernel arithmetic.
    x_big = jax.random.normal(kb, (512, input_dim), jnp.float32)
    out_grid = jax.block_until_ready(
        fwd(x_big, w1, b1, w2p, b2p, n_actions=n_actions))
    out_single = jax.block_until_ready(
        fwd(x_big, w1, b1, w2p, b2p, n_actions=n_actions, batch_tile=1024))
    assert out_grid.shape == (512, n_actions)
    assert jnp.allclose(out_grid, out_single, atol=1e-5, rtol=1e-5)

    print("KERNEL_OK")
</pallas_src>

<mosaic_0001>
module attributes {stable_mosaic.version = 11 : i64} {
  func.func @fc_agent_kernel(%arg0: memref<2x16xf32, #tpu.memory_space<vmem>>, %arg1: memref<16x128xf32, #tpu.memory_space<vmem>>, %arg2: memref<1x128xf32, #tpu.memory_space<vmem>>, %arg3: memref<128x128xf32, #tpu.memory_space<vmem>>, %arg4: memref<1x128xf32, #tpu.memory_space<vmem>>, %arg5: memref<2x4xf32, #tpu.memory_space<vmem>>) attributes {dimension_semantics = [], scalar_prefetch = 0 : i64, scratch_operands = 0 : i64, tpu.core_type = #tpu.core_type<tc>} {
    %c0 = arith.constant 0 : index
    %c0_0 = arith.constant 0 : index
    %0 = vector.load %arg0[%c0, %c0_0] : memref<2x16xf32, #tpu.memory_space<vmem>>, vector<2x16xf32>
    %c0_1 = arith.constant 0 : index
    %c0_2 = arith.constant 0 : index
    %1 = vector.load %arg1[%c0_1, %c0_2] : memref<16x128xf32, #tpu.memory_space<vmem>>, vector<16x128xf32>
    %cst = arith.constant dense<0.000000e+00> : vector<2x128xf32>
    %2 = tpu.matmul %0, %1, %cst {dimension_numbers = #tpu.dot_dimension_numbers<[1], [0], [0], [1], [0, 0, 1, 1], [], []>} : vector<2x16xf32>, vector<16x128xf32>, vector<2x128xf32> -> vector<2x128xf32>
    %c0_3 = arith.constant 0 : index
    %c0_4 = arith.constant 0 : index
    %3 = vector.load %arg2[%c0_3, %c0_4] : memref<1x128xf32, #tpu.memory_space<vmem>>, vector<1x128xf32>
    %4 = vector.broadcast %3 : vector<1x128xf32> to vector<2x128xf32>
    %5 = arith.addf %2, %4 : vector<2x128xf32>
    %cst_5 = arith.constant 0.000000e+00 : f32
    %6 = vector.broadcast %cst_5 : f32 to vector<2x128xf32>
    %7 = arith.maximumf %5, %6 : vector<2x128xf32>
    %c0_6 = arith.constant 0 : index
    %c0_7 = arith.constant 0 : index
    %8 = vector.load %arg3[%c0_6, %c0_7] : memref<128x128xf32, #tpu.memory_space<vmem>>, vector<128x128xf32>
    %cst_8 = arith.constant dense<0.000000e+00> : vector<2x128xf32>
    %9 = tpu.matmul %7, %8, %cst_8 {dimension_numbers = #tpu.dot_dimension_numbers<[1], [0], [0], [1], [0, 0, 1, 1], [], []>} : vector<2x128xf32>, vector<128x128xf32>, vector<2x128xf32> -> vector<2x128xf32>
    %c0_9 = arith.constant 0 : index
    %c0_10 = arith.constant 0 : index
    %10 = vector.load %arg4[%c0_9, %c0_10] : memref<1x128xf32, #tpu.memory_space<vmem>>, vector<1x128xf32>
    %11 = vector.broadcast %10 : vector<1x128xf32> to vector<2x128xf32>
    %12 = arith.addf %9, %11 : vector<2x128xf32>
    %13 = vector.extract_strided_slice %12 {offsets = [0, 0], sizes = [2, 4], strides = [1, 1]} : vector<2x128xf32> to vector<2x4xf32>
    %c0_11 = arith.constant 0 : index
    %c0_12 = arith.constant 0 : index
    %14 = vector.load %arg5[%c0_11, %c0_12] : memref<2x4xf32, #tpu.memory_space<vmem>>, vector<2x4xf32>
    tpu.vector_store %arg5[%c0_11, %c0_12], %13 {strides = array<i32>} : memref<2x4xf32, #tpu.memory_space<vmem>>, vector<2x4xf32>,
    return
  }
}

</mosaic_0001>

<bundles_post_ra>
// kernel: fc_agent_forward.1
= control target key start
LH: loop header
LB: loop body
LE: loop exit
PB: predicated region body
PF: predicated region fallthrough
CT: control target
= control target key end

     0   :  { %10 = vsyncpa [#allocation3], 0  ;;  %s471_s0 = inlined_call_operand.hbm [shape: f32[2,16], index: 0, kind: input, shape index: {}]   ;;  %s472_s1 = inlined_call_operand.hbm [shape: f32[16,128], index: 1, kind: input, shape index: {}]   ;;  %s473_s2 = inlined_call_operand.vmem [shape: f32[1,128], index: 2, kind: input, shape index: {}]   ;;  %s474_s3 = inlined_call_operand.hbm [shape: f32[128,128], index: 3, kind: input, shape index: {}]   ;;  %s475_s4 = inlined_call_operand.vmem [shape: f32[1,128], index: 4, kind: input, shape index: {}]   ;;  %s476_s5 = inlined_call_operand.hbm [shape: f32[2,4], index: 5, kind: output, shape index: {}]  }
   0x1   :  { %11 = vsyncpa [#allocation6], 0 }
   0x2   :  { %12 = vsyncpa [#allocation4], 0  ;;  %s415_s18 = smov [#allocation5]  }
   0x3   :  { %s28_s19 = sshll.u32 %s415_s18, 4  ;;  %s29_s19 = int_to_ptr.vmem [resolvable:$true] %s28_s19 }
   0x4   :  { %s337_s20 = scalar_lea.vmem %s29_s19, 256  ;;  %p342_p1 = scmp.lt.s32.totalorder %s29_s19, %s29_s19 }
   0x5   :  { %p338_p0 = scmp.ne.s32.totalorder %s29_s19, %s337_s20  ;;  %p343_p2 = scmp.lt.s32.totalorder %s337_s20, %s337_s20 }
   0x7   :  { %p344_p3 = por %p343_p2, %p342_p1 }
   0x9   :  { %p345_p4 = pnand %p344_p3, %p338_p0 }
   0xb   :  { %348 = shalt.err (!%p345_p4)
}
   0xc   :  { %s416_s21 = smov 128   ;;  %s417_s22 = smov 8  }
   0xd   :  { %34 = dma.hbm_to_vmem [thread:$0]  %s472_s1, 256, %s29_s19, [#allocation6], %s416_s21, %s416_s21, %s417_s22  }
   0xe   :  { %s418_s25 = smov [#allocation2]   ;;  %s419_s27 = smov [#allocation7]  }
   0xf   :  { %s19_s26 = sshll.u32 %s418_s25, 4  ;;  %s42_s28 = sshll.u32 %s419_s27, 4  ;;  %s20_s26 = int_to_ptr.vmem [resolvable:$true] %s19_s26  ;;  %s43_s28 = int_to_ptr.vmem [resolvable:$true] %s42_s28 }
  0x10   :  { %s357_s29 = scalar_lea.vmem %s20_s26, 32  ;;  %p362_p6 = scmp.lt.s32.totalorder %s20_s26, %s20_s26 }
  0x11   :  { %p358_p5 = scmp.ne.s32.totalorder %s20_s26, %s357_s29  ;;  %p363_p7 = scmp.lt.s32.totalorder %s357_s29, %s357_s29 }
  0x13   :  { %p364_p8 = por %p363_p7, %p362_p6 }
  0x15   :  { %p365_p9 = pnand %p364_p8, %p358_p5 }
  0x17   :  { %368 = shalt.err (!%p365_p9)
}
  0x18   :  { %22 = dma.hbm_to_vmem [thread:$0]  %s471_s0, 32, %s20_s26, [#allocation3]  }
  0x19   :  { %s377_s7 = scalar_lea.vmem %s43_s28, 2048  ;;  %p382_p11 = scmp.lt.s32.totalorder %s43_s28, %s43_s28 }
  0x1a   :  { %p378_p10 = scmp.ne.s32.totalorder %s43_s28, %s377_s7  ;;  %p383_p12 = scmp.lt.s32.totalorder %s377_s7, %s377_s7 }
  0x1c   :  { %p384_p13 = por %p383_p12, %p382_p11 }
  0x1e   :  { %p385_p0 = pnand %p384_p13, %p378_p10 }
  0x20   :  { %388 = shalt.err (!%p385_p0)
}
  0x21   :  { %48 = dma.hbm_to_vmem [thread:$0]  %s474_s3, 2048, %s43_s28, [#allocation6], %s416_s21, %s416_s21, %s417_s22  }
  0x22   :  { %409 = dma.done.wait [#allocation3], 32  }
  0x23   :  { %410 = vsyncadd [#allocation3], 4294967264 }
  0x24   :  { %411 = dma.done.wait [#allocation6], 2304  }
  0x25   :  { %412 = vsyncadd [#allocation6], 4294964992  ;;  %v420_v0 = vmov 0.0   ;;  %vm421_vm0 = vmmov 0   ;;  %v62_v1 = vld [vmem:[#allocation5 + $0x8] sm:$0xff]  ;;  %v61_v2 = vld [vmem:[#allocation5] sm:$0xff] }
  0x26   :  { %279 = vmatprep.subr.mxu0 %v420_v0  ;;  %283 = vmatprep.mubr.msk.f32.mxu0 %vm421_vm0, %v420_v0  ;;  %v60_v3 = vld [vmem:[#allocation2] sm:$0x3]  ;;  %vm70_vm1 = vcmask 130048   ;;  %v160_v4 = vld [vmem:[#allocation7 + $0x78] sm:$0xff]  ;;  %v159_v5 = vld [vmem:[#allocation7 + $0x70] sm:$0xff]  ;;  %s422_s11 = smov [#allocation8]  }
  0x27   :  { %286 = vmatprep.subr.mxu1 %v420_v0  ;;  %318 = vmatprep.mubr.msk.f32.mxu1 %vm421_vm0, %v420_v0  ;;  %v158_v6 = vld [vmem:[#allocation7 + $0x68] sm:$0xff]  ;;  %v157_v7 = vld [vmem:[#allocation7 + $0x60] sm:$0xff]  ;;  %v156_v8 = vld [vmem:[#allocation7 + $0x58] sm:$0xff]  ;;  %s246_s12 = sshll.u32 %s422_s11, 4  ;;  %vm238_vm2 = vcmask 25600   ;;  %s247_s12 = int_to_ptr.vmem [resolvable:$true] %s246_s12 }
  0x28   :  { %280 = vmatpush3.msra.mxu0 %v62_v1  ;;  %287 = vmatpush3.msra.mxu1 %v160_v4  ;;  %v155_v9 = vld [vmem:[#allocation7 + $0x50] sm:$0xff]  ;;  %v154_v10 = vld [vmem:[#allocation7 + $0x48] sm:$0xff]  ;;  %v153_v11 = vld [vmem:[#allocation7 + $0x40] sm:$0xff]  ;;  %s389_s13 = scalar_lea.vmem %s247_s12, 32  ;;  %p394_p2 = scmp.lt.s32.totalorder %s247_s12, %s247_s12 }
  0x29   :  { %281 = vmatprep.subr.mxu0 %v420_v0  ;;  %288 = vmatprep.subr.mxu1 %v420_v0  ;;  %v152_v12 = vld [vmem:[#allocation7 + $0x38] sm:$0xff]  ;;  %v151_v13 = vld [vmem:[#allocation7 + $0x30] sm:$0xff]  ;;  %v150_v14 = vld [vmem:[#allocation7 + $0x28] sm:$0xff]  ;;  %p390_p1 = scmp.ne.s32.totalorder %s247_s12, %s389_s13  ;;  %p395_p3 = scmp.lt.s32.totalorder %s389_s13, %s389_s13 }
  0x2a   :  { %282 = vmatpush3.msra.mxu0 %v61_v2  ;;  %289 = vmatpush3.msra.mxu1 %v159_v5  ;;  %v149_v15 = vld [vmem:[#allocation7 + $0x20] sm:$0xff]  ;;  %v148_v16 = vld [vmem:[#allocation7 + $0x18] sm:$0xff]  ;;  %v147_v17 = vld [vmem:[#allocation7 + $0x10] sm:$0xff] }
  0x2b   :  { %284 = vmatmul.mubr.msk.f32.vlgmr.msra.gmra.mxu0 %vm70_vm1, %v60_v3  ;;  %290 = vmatprep.subr.mxu1 %v420_v0  ;;  %v146_v18 = vld [vmem:[#allocation7 + $0x8] sm:$0xff]  ;;  %v145_v19 = vld [vmem:[#allocation7] sm:$0xff]  ;;  %p396_p4 = por %p395_p3, %p394_p2 }
  0x2c   :  { %291 = vmatpush3.msra.mxu1 %v158_v6  ;;  %v256_v20 = vld [vmem:[%s473_s2] ss:$0 sm:$0xff] }
  0x2d   :  { %292 = vmatprep.subr.mxu1 %v420_v0  ;;  %v258_v25 = vld [vmem:[%s475_s4] ss:$0 sm:$0xff]  ;;  %p397_p5 = pnand %p396_p4, %p390_p1 }
  0x2e   :  { %293 = vmatpush3.msra.mxu1 %v157_v7 }
  0x2f   :  { %294 = vmatprep.subr.mxu1 %v420_v0 }
  0x30   :  { %295 = vmatpush3.msra.mxu1 %v156_v8 }
  0x31   :  { %296 = vmatprep.subr.mxu1 %v420_v0 }
  0x32   :  { %297 = vmatpush3.msra.mxu1 %v155_v9 }
  0x33   :  { %298 = vmatprep.subr.mxu1 %v420_v0 }
  0x34   :  { %299 = vmatpush3.msra.mxu1 %v154_v10 }
  0x35   :  { %300 = vmatprep.subr.mxu1 %v420_v0 }
  0x36   :  { %301 = vmatpush3.msra.mxu1 %v153_v11 }
  0x37   :  { %302 = vmatprep.subr.mxu1 %v420_v0 }
  0x38   :  { %303 = vmatpush3.msra.mxu1 %v152_v12 }
  0x39   :  { %304 = vmatprep.subr.mxu1 %v420_v0 }
  0x3a   :  { %305 = vmatpush3.msra.mxu1 %v151_v13 }
  0x3b   :  { %306 = vmatprep.subr.mxu1 %v420_v0 }
  0x3c   :  { %307 = vmatpush3.msra.mxu1 %v150_v14 }
  0x3d   :  { %308 = vmatprep.subr.mxu1 %v420_v0 }
  0x3e   :  { %309 = vmatpush3.msra.mxu1 %v149_v15 }
  0x3f   :  { %310 = vmatprep.subr.mxu1 %v420_v0 }
  0x40   :  { %311 = vmatpush3.msra.mxu1 %v148_v16 }
  0x41   :  { %312 = vmatprep.subr.mxu1 %v420_v0 }
  0x42   :  { %313 = vmatpush3.msra.mxu1 %v147_v17 }
  0x43   :  { %314 = vmatprep.subr.mxu1 %v420_v0 }
  0x44   :  { %315 = vmatpush3.msra.mxu1 %v146_v18 }
  0x45   :  { %316 = vmatprep.subr.mxu1 %v420_v0 }
  0x46   :  { %317 = vmatpush3.msra.mxu1 %v145_v19 }
  0xeb   :  { %v140_v21 = vpop.f32.mrf.mxu0 }
  0xec   :  { %v141_v22 = vadd.f32 %v256_v20, %v140_v21 }
  0xed   :  { %v285_v23 = vpop.f32.mrf.mxu0 }
  0xee   :  { %v144_v24 = vmax.f32 %v141_v22, 0.0 }
  0xf0   :  { %319 = vmatmul.mubr.f32.vlgmr.msra.gmra.mxu1 %v144_v24 }
 0x1b0   :  { %v234_v26 = vpop.f32.mrf.mxu1 }
 0x1b1   :  { %v235_v27 = vadd.f32 %v258_v25, %v234_v26 }
 0x1b2   :  { %v320_v28 = vpop.f32.mrf.mxu1 }
 0x1b3   :  { %239 = vst.msk [vmem:[#allocation8] sm:$0x3] %vm238_vm2, %v235_v27 }
 0x1b4   :  { %400 = shalt.err (!%p397_p5)
}
 0x1b5   :  { %249 = dma.vmem_to_hbm [thread:$0]  %s247_s12, 32, %s476_s5, [#allocation4]  }
 0x1b6   :  { %413 = dma.done.wait [#allocation4], 32  }
 0x1b7   :  { %414 = vsyncadd [#allocation4], 4294967264 }
 0x1b8   :  { %253 = vsyncpa [#allocation3], 1 }
 0x1b9   :  { %254 = vsyncpa [#allocation6], 1 }
 0x1ba   :  { %255 = vsyncpa [#allocation4], 1 }

</bundles_post_ra>
